<compile_context>
chip_gen: v7x
topology: tpu7x:2x2x1
jax: 0.10.0
libtpu: 0.0.40
codegen_flags: <defaults>
</compile_context>

<pallas_src>
import functools

import jax
import jax.numpy as jnp
from jax.experimental import pallas as pl
from jax.experimental.pallas import tpu as pltpu

MARGIN = 0.2


def _triplet_kernel(a_ref, p_ref, n_ref, loss_ref, corr_ref, acc_ref, *,
                    batch_size, block_rows):
    i = pl.program_id(0)

    @pl.when(i == 0)
    def _init():
        acc_ref[0] = jnp.float32(0.0)   # running sum of hinge loss
        acc_ref[1] = jnp.float32(0.0)   # running count of pos_dist > neg_dist

    a = a_ref[...].astype(jnp.float32)
    p = p_ref[...].astype(jnp.float32)
    n = n_ref[...].astype(jnp.float32)

    # Fused distance difference: one cross-lane reduction instead of two.
    #   d = pos_dist - neg_dist = sum((n - p) * (2a - p - n), axis=1)
    d = jnp.sum((n - p) * (2.0 * a - p - n), axis=1, keepdims=True)  # (TB, 1)

    # Mask padded rows of a (possibly partial) last block.
    row = i * block_rows + jax.lax.broadcasted_iota(jnp.int32, d.shape, 0)
    valid = row < batch_size

    loss = jnp.where(valid, jnp.maximum(d + MARGIN, 0.0), 0.0)
    corr = jnp.where(valid & (d > 0.0), 1.0, 0.0)

    acc_ref[0] += jnp.sum(loss)
    acc_ref[1] += jnp.sum(corr)

    @pl.when(i == pl.num_programs(0) - 1)
    def _finalize():
        inv_b = jnp.float32(1.0 / batch_size)
        loss_ref[0, 0] = acc_ref[0] * inv_b
        corr_ref[0, 0] = acc_ref[1] * inv_b


def _choose_block_rows(B, D, itemsize):
    """Pick a batch-tile height: big enough to stream near HBM roofline, small
    enough that 3 inputs x 2 pipeline buffers fit comfortably in scoped VMEM
    (incl. v7x's 64 MiB physical VMEM)."""
    sublane = {4: 8, 2: 16, 1: 32}.get(itemsize, 8)
    budget = 24 * 1024 * 1024                      # bytes for input pipeline buffers
    max_rows = max(sublane, budget // (6 * D * itemsize))
    tb = min(1024, max_rows)
    tb = max(sublane, (tb // sublane) * sublane)
    if B <= tb:
        return B    # single block covering the whole batch (full-dim block is legal)
    return tb


def triplet_forward(anchor, positive, negative, *, block_rows=None):
    """Returns (mean_loss, corr_fraction) matching Triplet.forward semantics."""
    B, D = anchor.shape
    itemsize = jnp.dtype(anchor.dtype).itemsize
    tb = _choose_block_rows(B, D, itemsize) if block_rows is None else block_rows
    grid = (pl.cdiv(B, tb),)

    in_spec = pl.BlockSpec((tb, D), lambda i: (i, 0))
    out_spec = pl.BlockSpec(memory_space=pltpu.MemorySpace.SMEM)

    needed = 3 * 2 * tb * D * itemsize
    vmem_limit = int(min(64 * 1024 * 1024, max(2 * needed, 16 * 1024 * 1024)))

    kernel = functools.partial(_triplet_kernel, batch_size=B, block_rows=tb)

    loss, corr = pl.pallas_call(
        kernel,
        grid=grid,
        out_shape=(
            jax.ShapeDtypeStruct((1, 1), jnp.float32),  # mean loss
            jax.ShapeDtypeStruct((1, 1), jnp.float32),  # fraction pos_dist > neg_dist
        ),
        in_specs=[in_spec, in_spec, in_spec],
        out_specs=(out_spec, out_spec),
        scratch_shapes=[pltpu.SMEM((2,), jnp.float32)],
        compiler_params=pltpu.CompilerParams(
            dimension_semantics=("arbitrary",),   # output accumulator across the grid
            vmem_limit_bytes=vmem_limit,
        ),
        cost_estimate=pl.CostEstimate(
            flops=6 * B * D,
            transcendentals=0,
            bytes_accessed=3 * B * D * itemsize + 8,
        ),
    )(anchor, positive, negative)
    return loss[0, 0], corr[0, 0]


def _reference(anchor, positive, negative):
    a = anchor.astype(jnp.float32)
    p = positive.astype(jnp.float32)
    n = negative.astype(jnp.float32)
    pos_dist = jnp.sum((a - p) ** 2, axis=1)
    neg_dist = jnp.sum((a - n) ** 2, axis=1)
    loss = jnp.maximum(pos_dist - neg_dist + MARGIN, 0.0)
    corr = jnp.mean((pos_dist > neg_dist).astype(jnp.float32))
    return jnp.mean(loss), corr


if __name__ == "__main__":
    key = jax.random.PRNGKey(0)

    # Case 1: small embedding batch (single block path).
    k1, k2, k3, k4, k5, k6 = jax.random.split(key, 6)
    B, D = 8, 128
    anchor = jax.random.normal(k1, (B, D), dtype=jnp.float32)
    positive = jax.random.normal(k2, (B, D), dtype=jnp.float32)
    negative = jax.random.normal(k3, (B, D), dtype=jnp.float32)

    loss, corr = triplet_forward(anchor, positive, negative)
    loss = jax.block_until_ready(loss)
    corr = jax.block_until_ready(corr)
    ref_loss, ref_corr = _reference(anchor, positive, negative)
    assert jnp.allclose(loss, ref_loss, rtol=1e-5, atol=1e-5), (loss, ref_loss)
    assert jnp.allclose(corr, ref_corr, rtol=1e-6, atol=1e-6), (corr, ref_corr)

    # Case 2: multi-block path with a partial (masked) last tile.
    B2, D2 = 200, 128
    a2 = jax.random.normal(k4, (B2, D2), dtype=jnp.float32)
    p2 = jax.random.normal(k5, (B2, D2), dtype=jnp.float32)
    n2 = jax.random.normal(k6, (B2, D2), dtype=jnp.float32)

    loss2, corr2 = triplet_forward(a2, p2, n2, block_rows=64)  # grid=4, last tile masked
    loss2 = jax.block_until_ready(loss2)
    corr2 = jax.block_until_ready(corr2)
    ref_loss2, ref_corr2 = _reference(a2, p2, n2)
    assert jnp.allclose(loss2, ref_loss2, rtol=1e-5, atol=1e-5), (loss2, ref_loss2)
    assert jnp.allclose(corr2, ref_corr2, rtol=1e-6, atol=1e-6), (corr2, ref_corr2)

    # The PyTorch module returns a python float for corr/batch_size.
    _ = float(corr)

    print("KERNEL_OK")
</pallas_src>

<mosaic_0001>
module attributes {stable_mosaic.version = 11 : i64} {
  func.func @_triplet_kernel(%arg0: i32, %arg1: memref<8x128xf32, #tpu.memory_space<vmem>>, %arg2: memref<8x128xf32, #tpu.memory_space<vmem>>, %arg3: memref<8x128xf32, #tpu.memory_space<vmem>>, %arg4: memref<1x1xf32, #tpu.memory_space<smem>>, %arg5: memref<1x1xf32, #tpu.memory_space<smem>>, %arg6: memref<2xf32, #tpu.memory_space<smem>>) attributes {dimension_semantics = [#tpu.dimension_semantics<arbitrary>], iteration_bounds = array<i64: 1>, scalar_prefetch = 0 : i64, scratch_operands = 1 : i64, tpu.core_type = #tpu.core_type<tc>, window_params = [{transform_indices = @transform_0, window_bounds = array<i64: 8, 128>}, {transform_indices = @transform_1, window_bounds = array<i64: 8, 128>}, {transform_indices = @transform_2, window_bounds = array<i64: 8, 128>}, {transform_indices = @transform_3, window_bounds = array<i64: 1, 1>}, {transform_indices = @transform_4, window_bounds = array<i64: 1, 1>}]} {
    %c0_i32 = arith.constant 0 : i32
    %0 = arith.cmpi eq, %arg0, %c0_i32 : i32
    %1 = arith.extui %0 : i1 to i32
    %c0_i32_0 = arith.constant 0 : i32
    %2 = arith.cmpi ne, %1, %c0_i32_0 : i32
    scf.if %2 {
      %cst_21 = arith.constant 0.000000e+00 : f32
      %c0_22 = arith.constant 0 : index
      %49 = memref.load %arg6[%c0_22] : memref<2xf32, #tpu.memory_space<smem>>
      memref.store %cst_21, %arg6[%c0_22] : memref<2xf32, #tpu.memory_space<smem>>
      %cst_23 = arith.constant 0.000000e+00 : f32
      %c1_24 = arith.constant 1 : index
      %50 = memref.load %arg6[%c1_24] : memref<2xf32, #tpu.memory_space<smem>>
      memref.store %cst_23, %arg6[%c1_24] : memref<2xf32, #tpu.memory_space<smem>>
    } else {
    }
    %c0 = arith.constant 0 : index
    %c0_1 = arith.constant 0 : index
    %3 = vector.load %arg1[%c0, %c0_1] : memref<8x128xf32, #tpu.memory_space<vmem>>, vector<8x128xf32>
    %c0_2 = arith.constant 0 : index
    %c0_3 = arith.constant 0 : index
    %4 = vector.load %arg2[%c0_2, %c0_3] : memref<8x128xf32, #tpu.memory_space<vmem>>, vector<8x128xf32>
    %c0_4 = arith.constant 0 : index
    %c0_5 = arith.constant 0 : index
    %5 = vector.load %arg3[%c0_4, %c0_5] : memref<8x128xf32, #tpu.memory_space<vmem>>, vector<8x128xf32>
    %6 = arith.subf %5, %4 : vector<8x128xf32>
    %cst = arith.constant 2.000000e+00 : f32
    %7 = vector.broadcast %cst : f32 to vector<8x128xf32>
    %8 = arith.mulf %7, %3 : vector<8x128xf32>
    %9 = arith.subf %8, %4 : vector<8x128xf32>
    %10 = arith.subf %9, %5 : vector<8x128xf32>
    %11 = arith.mulf %6, %10 : vector<8x128xf32>
    %cst_6 = arith.constant dense<0.000000e+00> : vector<8xf32>
    %12 = vector.multi_reduction <add>, %11, %cst_6 [1] : vector<8x128xf32> to vector<8xf32>
    %13 = vector.shape_cast %12 : vector<8xf32> to vector<8x1xf32>
    %c8_i32 = arith.constant 8 : i32
    %14 = arith.muli %arg0, %c8_i32 : i32
    %15 = tpu.iota {dimensions = array<i32: 0>} : vector<8x1xi32>
    %16 = vector.broadcast %14 : i32 to vector<8x1xi32>
    %17 = arith.addi %16, %15 : vector<8x1xi32>
    %c8_i32_7 = arith.constant 8 : i32
    %18 = vector.broadcast %c8_i32_7 : i32 to vector<8x1xi32>
    %19 = arith.cmpi slt, %17, %18 : vector<8x1xi32>
    %cst_8 = arith.constant 2.000000e-01 : f32
    %20 = vector.broadcast %cst_8 : f32 to vector<8x1xf32>
    %21 = arith.addf %13, %20 : vector<8x1xf32>
    %cst_9 = arith.constant 0.000000e+00 : f32
    %22 = vector.broadcast %cst_9 : f32 to vector<8x1xf32>
    %23 = arith.maximumf %21, %22 : vector<8x1xf32>
    %cst_10 = arith.constant 0.000000e+00 : f32
    %24 = vector.broadcast %cst_10 : f32 to vector<8x1xf32>
    %25 = arith.select %19, %23, %24 : vector<8x1xi1>, vector<8x1xf32>
    %cst_11 = arith.constant 0.000000e+00 : f32
    %26 = vector.broadcast %cst_11 : f32 to vector<8x1xf32>
    %27 = arith.cmpf ogt, %13, %26 : vector<8x1xf32>
    %28 = arith.andi %19, %27 : vector<8x1xi1>
    %cst_12 = arith.constant 1.000000e+00 : f32
    %cst_13 = arith.constant 0.000000e+00 : f32
    %29 = vector.broadcast %cst_12 : f32 to vector<8x1xf32>
    %30 = vector.broadcast %cst_13 : f32 to vector<8x1xf32>
    %31 = arith.select %28, %29, %30 : vector<8x1xi1>, vector<8x1xf32>
    %c0_14 = arith.constant 0 : index
    %32 = memref.load %arg6[%c0_14] : memref<2xf32, #tpu.memory_space<smem>>
    %33 = vector.shape_cast %25 : vector<8x1xf32> to vector<1x8x1xf32>
    %cst_15 = arith.constant dense<0.000000e+00> : vector<1xf32>
    %34 = vector.multi_reduction <add>, %33, %cst_15 [1, 2] : vector<1x8x1xf32> to vector<1xf32>
    %35 = vector.shape_cast %34 : vector<1xf32> to vector<1x1x1xf32>
    %36 = vector.extract %35[0, 0, 0] : f32 from vector<1x1x1xf32>
    %37 = arith.addf %32, %36 : f32
    %c0_16 = arith.constant 0 : index
    %38 = memref.load %arg6[%c0_16] : memref<2xf32, #tpu.memory_space<smem>>
    memref.store %37, %arg6[%c0_16] : memref<2xf32, #tpu.memory_space<smem>>
    %c1 = arith.constant 1 : index
    %39 = memref.load %arg6[%c1] : memref<2xf32, #tpu.memory_space<smem>>
    %40 = vector.shape_cast %31 : vector<8x1xf32> to vector<1x8x1xf32>
    %cst_17 = arith.constant dense<0.000000e+00> : vector<1xf32>
    %41 = vector.multi_reduction <add>, %40, %cst_17 [1, 2] : vector<1x8x1xf32> to vector<1xf32>
    %42 = vector.shape_cast %41 : vector<1xf32> to vector<1x1x1xf32>
    %43 = vector.extract %42[0, 0, 0] : f32 from vector<1x1x1xf32>
    %44 = arith.addf %39, %43 : f32
    %c1_18 = arith.constant 1 : index
    %45 = memref.load %arg6[%c1_18] : memref<2xf32, #tpu.memory_space<smem>>
    memref.store %44, %arg6[%c1_18] : memref<2xf32, #tpu.memory_space<smem>>
    %c0_i32_19 = arith.constant 0 : i32
    %46 = arith.cmpi eq, %arg0, %c0_i32_19 : i32
    %47 = arith.extui %46 : i1 to i32
    %c0_i32_20 = arith.constant 0 : i32
    %48 = arith.cmpi ne, %47, %c0_i32_20 : i32
    scf.if %48 {
      %c0_21 = arith.constant 0 : index
      %49 = memref.load %arg6[%c0_21] : memref<2xf32, #tpu.memory_space<smem>>
      %cst_22 = arith.constant 1.250000e-01 : f32
      %50 = arith.mulf %49, %cst_22 : f32
      %c0_23 = arith.constant 0 : index
      %c0_24 = arith.constant 0 : index
      %51 = memref.load %arg4[%c0_23, %c0_24] : memref<1x1xf32, #tpu.memory_space<smem>>
      memref.store %50, %arg4[%c0_23, %c0_24] : memref<1x1xf32, #tpu.memory_space<smem>>
      %c1_25 = arith.constant 1 : index
      %52 = memref.load %arg6[%c1_25] : memref<2xf32, #tpu.memory_space<smem>>
      %cst_26 = arith.constant 1.250000e-01 : f32
      %53 = arith.mulf %52, %cst_26 : f32
      %c0_27 = arith.constant 0 : index
      %c0_28 = arith.constant 0 : index
      %54 = memref.load %arg5[%c0_27, %c0_28] : memref<1x1xf32, #tpu.memory_space<smem>>
      memref.store %53, %arg5[%c0_27, %c0_28] : memref<1x1xf32, #tpu.memory_space<smem>>
    } else {
    }
    return
  }
  func.func @transform_0(%arg0: i32) -> (i32, i32) {
    %c0_i32 = arith.constant 0 : i32
    %c0_i32_0 = arith.constant 0 : i32
    return %arg0, %c0_i32 : i32, i32
  }
  func.func @transform_1(%arg0: i32) -> (i32, i32) {
    %c0_i32 = arith.constant 0 : i32
    %c0_i32_0 = arith.constant 0 : i32
    return %arg0, %c0_i32 : i32, i32
  }
  func.func @transform_2(%arg0: i32) -> (i32, i32) {
    %c0_i32 = arith.constant 0 : i32
    %c0_i32_0 = arith.constant 0 : i32
    return %arg0, %c0_i32 : i32, i32
  }
  func.func @transform_3(%arg0: i32) -> (i32, i32) {
    %c0_i32 = arith.constant 0 : i32
    %c0_i32_0 = arith.constant 0 : i32
    %c0_i32_1 = arith.constant 0 : i32
    return %c0_i32, %c0_i32_0 : i32, i32
  }
  func.func @transform_4(%arg0: i32) -> (i32, i32) {
    %c0_i32 = arith.constant 0 : i32
    %c0_i32_0 = arith.constant 0 : i32
    %c0_i32_1 = arith.constant 0 : i32
    return %c0_i32, %c0_i32_0 : i32, i32
  }
}

</mosaic_0001>

<bundles_post_ra>
// kernel: tpu_custom_call.1
= control target key start
LH: loop header
LB: loop body
LE: loop exit
PB: predicated region body
PF: predicated region fallthrough
CT: control target
= control target key end

     0   :  { %10 = vsyncpa [#allocation4], 0  ;;  %s347_s0 = inlined_call_operand.hbm [shape: f32[8,128], index: 0, kind: input, shape index: {}]   ;;  %s348_s1 = inlined_call_operand.hbm [shape: f32[8,128], index: 1, kind: input, shape index: {}]   ;;  %s349_s2 = inlined_call_operand.hbm [shape: f32[8,128], index: 2, kind: input, shape index: {}]   ;;  %s350_s3 = inlined_call_operand.hbm [shape: f32[1,1], index: 3, kind: output, shape index: {0}]   ;;  %s351_s4 = inlined_call_operand.hbm [shape: f32[1,1], index: 4, kind: output, shape index: {1}]  }
   0x1   :  { %11 = vsyncpa [#allocation7], 0 }
   0x2   :  { %12 = vsyncpa [#allocation5], 0 }
   0x3   :  { %13 = vsyncpa [#allocation11], 0  ;;  %s256_s15 = smov [#allocation6]   ;;  %s257_s17 = smov [#allocation3]  }
   0x4   :  { %s30_s16 = sshll.u32 %s256_s15, 4  ;;  %s20_s18 = sshll.u32 %s257_s17, 4  ;;  %s31_s16 = int_to_ptr.vmem [resolvable:$true] %s30_s16  ;;  %s21_s18 = int_to_ptr.vmem [resolvable:$true] %s20_s18 }
   0x5   :  { %s162_s21 = scalar_lea.hbm %s348_s1, 128 }
   0x6   :  { %p163_p0 = scmp.ne.s32.totalorder %s348_s1, %s162_s21  ;;  %p166_p1 = scmp.lt.u32.totalorder %s162_s21, %s348_s1 }
   0x8   :  { %p168_p2 = pnand %p166_p1, %p163_p0 }
   0xa   :  { %171 = shalt.err (!%p168_p2)
}
   0xb   :  { %s172_s26 = scalar_lea.vmem %s31_s16, 128  ;;  %p177_p4 = scmp.lt.s32.totalorder %s31_s16, %s31_s16 }
   0xc   :  { %p173_p3 = scmp.ne.s32.totalorder %s31_s16, %s172_s26  ;;  %p178_p5 = scmp.lt.s32.totalorder %s172_s26, %s172_s26 }
   0xe   :  { %p179_p6 = por %p178_p5, %p177_p4 }
  0x10   :  { %p180_p7 = pnand %p179_p6, %p173_p3 }
  0x12   :  { %183 = shalt.err (!%p180_p7)
}
  0x13   :  { %33 = dma.hbm_to_vmem [thread:$0]  %s348_s1, 128, %s31_s16, [#allocation7]  }
  0x14   :  { %s184_s5 = scalar_lea.hbm %s347_s0, 128 }
  0x15   :  { %p185_p8 = scmp.ne.s32.totalorder %s347_s0, %s184_s5  ;;  %p188_p9 = scmp.lt.u32.totalorder %s184_s5, %s347_s0 }
  0x17   :  { %p190_p10 = pnand %p188_p9, %p185_p8 }
  0x19   :  { %193 = shalt.err (!%p190_p10)
}
  0x1a   :  { %s194_s10 = scalar_lea.vmem %s21_s18, 128  ;;  %p199_p12 = scmp.lt.s32.totalorder %s21_s18, %s21_s18 }
  0x1b   :  { %p195_p11 = scmp.ne.s32.totalorder %s21_s18, %s194_s10  ;;  %p200_p13 = scmp.lt.s32.totalorder %s194_s10, %s194_s10 }
  0x1d   :  { %p201_p0 = por %p200_p13, %p199_p12 }
  0x1f   :  { %p202_p1 = pnand %p201_p0, %p195_p11 }
  0x21   :  { %205 = shalt.err (!%p202_p1)
}
  0x22   :  { %23 = dma.hbm_to_vmem [thread:$0]  %s347_s0, 128, %s21_s18, [#allocation4]  }
  0x23   :  { %s258_s12 = smov [#allocation8]   ;;  %s206_s16 = scalar_lea.hbm %s349_s2, 128 }
  0x24   :  { %s40_s13 = sshll.u32 %s258_s12, 4  ;;  %p207_p2 = scmp.ne.s32.totalorder %s349_s2, %s206_s16  ;;  %s41_s13 = int_to_ptr.vmem [resolvable:$true] %s40_s13 }
  0x25   :  { %p210_p3 = scmp.lt.u32.totalorder %s206_s16, %s349_s2 }
  0x27   :  { %p212_p4 = pnand %p210_p3, %p207_p2 }
  0x29   :  { %215 = shalt.err (!%p212_p4)
}
  0x2a   :  { %s216_s22 = scalar_lea.vmem %s41_s13, 128  ;;  %p221_p6 = scmp.lt.s32.totalorder %s41_s13, %s41_s13 }
  0x2b   :  { %p217_p5 = scmp.ne.s32.totalorder %s41_s13, %s216_s22  ;;  %p222_p7 = scmp.lt.s32.totalorder %s216_s22, %s216_s22 }
  0x2d   :  { %p223_p8 = por %p222_p7, %p221_p6 }
  0x2f   :  { %p224_p9 = pnand %p223_p8, %p217_p5 }
  0x31   :  { %227 = shalt.err (!%p224_p9)
}
  0x32   :  { %43 = dma.hbm_to_vmem [thread:$0]  %s349_s2, 128, %s41_s13, [#allocation7]  }
  0x33   :  { %248 = dma.done.wait [#allocation4], 128  }
  0x34   :  { %249 = vsyncadd [#allocation4], 4294967168 }
  0x35   :  { %250 = dma.done.wait [#allocation7], 256  }
  0x36   :  { %251 = vsyncadd [#allocation7], 4294967040  ;;  %v61_v0 = vld [vmem:[#allocation3] sm:$0xff]  ;;  %v62_v1 = vld [vmem:[#allocation6] sm:$0xff]  ;;  %vm84_vm0 = vcmask 7168   ;;  %v259_v10 = vmov 0.0  }
  0x37   :  { %v63_v2 = vld [vmem:[#allocation8] sm:$0xff]  ;;  %v65_v3 = vmul.f32 2.0, %v61_v0  ;;  %s228_s28 = scalar_lea.hbm %s350_s3, 16 }
  0x38   :  { %v64_v4 = vsub.f32 %v63_v2, %v62_v1  ;;  %p229_p10 = scmp.ne.s32.totalorder %s350_s3, %s228_s28  ;;  %p232_p11 = scmp.lt.u32.totalorder %s228_s28, %s350_s3 }
  0x39   :  { %v66_v5 = vsub.f32 %v65_v3, %v62_v1 }
  0x3a   :  { %p234_p12 = pnand %p232_p11, %p229_p10 }
  0x3b   :  { %v67_v6 = vsub.f32 %v66_v5, %v63_v2 }
  0x3d   :  { %v68_v7 = vmul.f32 %v67_v6, %v64_v4 }
  0x3f   :  { %69 = vadd.xlane.f32.xlu0 %v68_v7 }
  0xcc   :  { %v70_v8 = vpop.xlane.xlu0 %69 }
  0xcd   :  { %v77_v9 = vadd.f32 0.2, %v70_v8  ;;  %vm80_vm1 = vcmp.gt.f32.partialorder %v70_v8, 0.0 }
  0xce   :  { %v82_v11 = vsel %vm80_vm1, 1.0, %v259_v10 }
  0xcf   :  { %v78_v12 = vmax.f32 %v77_v9, 0.0  ;;  %v99_v13 = vsel %vm84_vm0, %v82_v11, 0.0 }
  0xd0   :  { %100 = vadd.xlane.f32.xlu1 %v99_v13 }
  0xd1   :  { %v85_v14 = vsel %vm84_vm0, %v78_v12, 0.0 }
  0xd2   :  { %86 = vadd.xlane.f32.xlu0 %v85_v14 }
 0x15d   :  { %v101_v15 = vpop.xlane.xlu1 %100 }
 0x15e   :  { %v102_v16 = vrot.slane %v101_v15, 4 }
 0x15f   :  { %v87_v17 = vpop.xlane.xlu0 %86 }
 0x160   :  { %v103_v18 = vadd.f32 %v102_v16, %v101_v15  ;;  %v88_v19 = vrot.slane %v87_v17, 4 }
 0x162   :  { %v104_v20 = vrot.slane %v103_v18, 2  ;;  %v89_v21 = vadd.f32 %v88_v19, %v87_v17 }
 0x164   :  { %v105_v22 = vadd.f32 %v104_v20, %v103_v18  ;;  %v90_v23 = vrot.slane %v89_v21, 2 }
 0x166   :  { %v91_v24 = vadd.f32 %v90_v23, %v89_v21  ;;  %v106_v25 = vrot.slane %v105_v22, 1 }
 0x168   :  { %v92_v26 = vrot.slane %v91_v24, 1  ;;  %v107_v28 = vadd.f32 %v106_v25, %v105_v22 }
 0x16a   :  { %v93_v27 = vadd.f32 %v92_v26, %v91_v24 }
 0x16c   :  { %152 = vpush %v93_v27 }
 0x16d   :  { %154 = vpush %v107_v28 }
 0x19d   :  { %s153_s2 = spop %152 }
 0x19e   :  { %s116_s23 = smul.f32 0.125, %s153_s2  ;;  %s155_s24 = spop %154 }
 0x19f   :  { %s120_s25 = smul.f32 0.125, %s155_s24 }
 0x1a0   :  { %118 = sst [smem:[#allocation9]] %s116_s23 }
 0x1a1   :  { %237 = shalt.err (!%p234_p12)
}
 0x1a2   :  { %s260_s7 = smov [#allocation9]   ;;  %122 = sst [smem:[#allocation10]] %s120_s25 }
 0x1a3   :  { %130 = dma.smem_to_hbm %s260_s7, 16, %s350_s3, [#allocation5]  }
 0x1a4   :  { %s238_s11 = scalar_lea.hbm %s351_s4, 16 }
 0x1a5   :  { %p239_p13 = scmp.ne.s32.totalorder %s351_s4, %s238_s11  ;;  %p242_p0 = scmp.lt.u32.totalorder %s238_s11, %s351_s4 }
 0x1a7   :  { %p244_p1 = pnand %p242_p0, %p239_p13 }
 0x1a9   :  { %247 = shalt.err (!%p244_p1)
}
 0x1aa   :  { %s261_s16 = smov [#allocation10]  }
 0x1ab   :  { %138 = dma.smem_to_hbm %s261_s16, 16, %s351_s4, [#allocation11]  }
 0x1ac   :  { %252 = dma.done.wait [#allocation5], 16  }
 0x1ad   :  { %253 = vsyncadd [#allocation5], 4294967280 }
 0x1ae   :  { %254 = dma.done.wait [#allocation11], 16  }
 0x1af   :  { %255 = vsyncadd [#allocation11], 4294967280 }
 0x1b0   :  { %145 = sfence }
 0x1b1   :  { %146 = vsyncpa [#allocation4], 1 }
 0x1b2   :  { %147 = vsyncpa [#allocation7], 1 }
 0x1b3   :  { %148 = vsyncpa [#allocation5], 1 }
 0x1b4   :  { %149 = vsyncpa [#allocation11], 1 }

</bundles_post_ra>
